<compile_context>
chip_gen: v7x
topology: tpu7x:2x2x1
jax: 0.10.0
libtpu: 0.0.40
codegen_flags: <defaults>
</compile_context>

<pallas_src>
import functools

import jax
import jax.numpy as jnp
from jax.experimental import pallas as pl
from jax.experimental.pallas import tpu as pltpu

BN_EPS = 1e-5
NEG_SLOPE = 0.2


def _round_up(a, b):
    return (a + b - 1) // b * b


def _conv_partial_stats_kernel(x_ref, w_ref, y_ref, stats_ref):
    # x_ref: (1, Cin, Lt) bf16   w_ref: (Cout, Cin) bf16
    # y_ref: (1, Cout, Lt) f32   stats_ref: (1, 1, Cout, 2) f32
    y = jnp.dot(w_ref[...], x_ref[0], preferred_element_type=jnp.float32)  # (Cout, Lt) f32
    y_ref[0] = y
    # Per-tile partial per-channel sum and sum-of-squares (lane-axis reduce -> XLU slot).
    stats_ref[0, 0, :, 0:1] = jnp.sum(y, axis=1, keepdims=True)
    stats_ref[0, 0, :, 1:2] = jnp.sum(y * y, axis=1, keepdims=True)


def _bn_lrelu_kernel(y_ref, scale_ref, shift_ref, o_ref):
    # y_ref: (1, Cout, Lt) f32   scale/shift: (Cout, 1) f32   o_ref: (1, Cout, Lt) f32
    z = y_ref[0] * scale_ref[...] + shift_ref[...]
    o_ref[0] = jnp.where(z >= 0, z, NEG_SLOPE * z).astype(o_ref.dtype)


@functools.partial(jax.jit, static_argnames=("tile_l_target",))
def conv2d_1x1_bn_lrelu(x_nchw, weight, gamma, beta, *, tile_l_target=512):
    """x_nchw: (N, Cin, H, W) f32; weight: (Cout, Cin, 1, 1) f32 (Conv2d weight);
    gamma/beta: (Cout,) f32.  Returns (N, Cout, H, W) f32."""
    n, cin, h, w_sp = x_nchw.shape
    cout = weight.shape[0]
    l = h * w_sp

    # Tile the spatial axis in 128-multiples; tile VMEM footprint is tiny, so the
    # default scoped VMEM limit is ample even on v7x (64 MiB physical).
    assert tile_l_target % 128 == 0
    l_128 = _round_up(l, 128)
    tile_l = l_128 if l_128 <= tile_l_target else tile_l_target
    l_pad = _round_up(l, tile_l)
    num_tiles = l_pad // tile_l

    x3d = x_nchw.reshape(n, cin, l)
    if l_pad != l:
        x3d = jnp.pad(x3d, ((0, 0), (0, 0), (0, l_pad - l)))

    # bf16 inputs for the MXU (f32 accumulation inside the kernels).
    x_bf = x3d.astype(jnp.bfloat16)
    w_bf = weight.reshape(cout, cin).astype(jnp.bfloat16)

    # Pass 1: 1x1 conv (matmul) + per-tile partial BN statistics.
    y, stats = pl.pallas_call(
        _conv_partial_stats_kernel,
        grid=(n, num_tiles),
        in_specs=[
            pl.BlockSpec((1, cin, tile_l), lambda i, t: (i, 0, t)),
            pl.BlockSpec((cout, cin), lambda i, t: (0, 0)),
        ],
        out_specs=[
            pl.BlockSpec((1, cout, tile_l), lambda i, t: (i, 0, t)),
            pl.BlockSpec((1, 1, cout, 2), lambda i, t: (i, t, 0, 0)),
        ],
        out_shape=[
            jax.ShapeDtypeStruct((n, cout, l_pad), jnp.float32),
            jax.ShapeDtypeStruct((n, num_tiles, cout, 2), jnp.float32),
        ],
        compiler_params=pltpu.CompilerParams(
            dimension_semantics=("parallel", "parallel")),
    )(x_bf, w_bf)

    # Tiny per-channel reduction + fold of BN affine in plain JAX (f32).
    count = jnp.float32(n * l)                      # true pixel count (excludes padding)
    sums = jnp.sum(stats, axis=(0, 1))              # (Cout, 2)
    mean = sums[:, 0] / count
    var = jnp.maximum(sums[:, 1] / count - mean * mean, 0.0)
    inv_std = jax.lax.rsqrt(var + BN_EPS)
    scale = (gamma * inv_std).astype(jnp.float32).reshape(cout, 1)
    shift = (beta - mean * gamma * inv_std).astype(jnp.float32).reshape(cout, 1)

    # Pass 2: normalize (folded scale/shift) + LeakyReLU, streaming Y through VMEM.
    out = pl.pallas_call(
        _bn_lrelu_kernel,
        grid=(n, num_tiles),
        in_specs=[
            pl.BlockSpec((1, cout, tile_l), lambda i, t: (i, 0, t)),
            pl.BlockSpec((cout, 1), lambda i, t: (0, 0)),
            pl.BlockSpec((cout, 1), lambda i, t: (0, 0)),
        ],
        out_specs=pl.BlockSpec((1, cout, tile_l), lambda i, t: (i, 0, t)),
        out_shape=jax.ShapeDtypeStruct((n, cout, l_pad), jnp.float32),
        compiler_params=pltpu.CompilerParams(
            dimension_semantics=("parallel", "parallel")),
    )(y, scale, shift)

    return out[:, :, :l].reshape(n, cout, h, w_sp)


def _reference(x_nchw, weight, gamma, beta):
    # Pure-JAX reference of the PyTorch forward (train-mode BN), with the same
    # bf16-input / f32-accumulate matmul as the kernel.
    w2 = weight.reshape(weight.shape[0], weight.shape[1]).astype(jnp.bfloat16)
    y = jnp.einsum("oc,nchw->nohw", w2, x_nchw.astype(jnp.bfloat16),
                   preferred_element_type=jnp.float32)
    mean = jnp.mean(y, axis=(0, 2, 3), keepdims=True)
    var = jnp.mean((y - mean) ** 2, axis=(0, 2, 3), keepdims=True)
    y_hat = (y - mean) * jax.lax.rsqrt(var + BN_EPS)
    z = y_hat * gamma.reshape(1, -1, 1, 1) + beta.reshape(1, -1, 1, 1)
    return jnp.where(z >= 0, z, NEG_SLOPE * z)


if __name__ == "__main__":
    key = jax.random.PRNGKey(0)
    k_x, k_w, k_g, k_b, k_x2 = jax.random.split(key, 5)

    N, C_IN, C_OUT, H, W = 2, 4, 8, 16, 16

    x = jax.random.normal(k_x, (N, C_IN, H, W), dtype=jnp.float32)
    # Conv2d(in, out, kernel_size=1, bias=False).weight has shape (out, in, 1, 1)
    weight = 0.2 * jax.random.normal(k_w, (C_OUT, C_IN, 1, 1), dtype=jnp.float32)
    gamma = 1.0 + 0.1 * jax.random.normal(k_g, (C_OUT,), dtype=jnp.float32)
    beta = 0.1 * jax.random.normal(k_b, (C_OUT,), dtype=jnp.float32)

    out = jax.block_until_ready(conv2d_1x1_bn_lrelu(x, weight, gamma, beta))
    ref = _reference(x, weight, gamma, beta)
    assert out.shape == (N, C_OUT, H, W)
    assert jnp.allclose(out, ref, atol=2e-3, rtol=2e-3), float(jnp.max(jnp.abs(out - ref)))

    # Ragged spatial size (H*W not a multiple of 128) exercises the zero-pad path:
    # padded pixels must not perturb the batch statistics.
    x2 = jax.random.normal(k_x2, (N, C_IN, 9, 9), dtype=jnp.float32)
    out2 = jax.block_until_ready(conv2d_1x1_bn_lrelu(x2, weight, gamma, beta))
    ref2 = _reference(x2, weight, gamma, beta)
    assert out2.shape == (N, C_OUT, 9, 9)
    assert jnp.allclose(out2, ref2, atol=2e-3, rtol=2e-3), float(jnp.max(jnp.abs(out2 - ref2)))

    print("KERNEL_OK")
</pallas_src>

<mosaic_0001>
module attributes {stable_mosaic.version = 11 : i64} {
  func.func @_conv_partial_stats_kernel(%arg0: i32, %arg1: i32, %arg2: memref<1x4x256xbf16, #tpu.memory_space<vmem>>, %arg3: memref<8x4xbf16, #tpu.memory_space<vmem>>, %arg4: memref<1x8x256xf32, #tpu.memory_space<vmem>>, %arg5: memref<1x1x8x2xf32, #tpu.memory_space<vmem>>) attributes {dimension_semantics = [#tpu.dimension_semantics<parallel>, #tpu.dimension_semantics<parallel>], iteration_bounds = array<i64: 2, 1>, scalar_prefetch = 0 : i64, scratch_operands = 0 : i64, tpu.core_type = #tpu.core_type<tc>, window_params = [{transform_indices = @transform_0, window_bounds = array<i64: 1, 4, 256>}, {pipeline_mode = #tpu.pipeline_mode<synchronous>, transform_indices = @transform_1, window_bounds = array<i64: 8, 4>}, {transform_indices = @transform_2, window_bounds = array<i64: 1, 8, 256>}, {transform_indices = @transform_3, window_bounds = array<i64: 1, 1, 8, 2>}]} {
    %c0 = arith.constant 0 : index
    %c0_0 = arith.constant 0 : index
    %0 = vector.load %arg3[%c0, %c0_0] : memref<8x4xbf16, #tpu.memory_space<vmem>>, vector<8x4xbf16>
    %c0_1 = arith.constant 0 : index
    %c0_2 = arith.constant 0 : index
    %c0_3 = arith.constant 0 : index
    %1 = vector.load %arg2[%c0_1, %c0_2, %c0_3] : memref<1x4x256xbf16, #tpu.memory_space<vmem>>, vector<1x4x256xbf16>
    %2 = vector.shape_cast %1 : vector<1x4x256xbf16> to vector<4x256xbf16>
    %cst = arith.constant dense<0.000000e+00> : vector<8x256xf32>
    %3 = tpu.matmul %0, %2, %cst {dimension_numbers = #tpu.dot_dimension_numbers<[1], [0], [0], [1], [0, 0, 1, 1], [], []>} : vector<8x4xbf16>, vector<4x256xbf16>, vector<8x256xf32> -> vector<8x256xf32>
    %c0_4 = arith.constant 0 : index
    %c0_5 = arith.constant 0 : index
    %c0_6 = arith.constant 0 : index
    %4 = vector.load %arg4[%c0_4, %c0_5, %c0_6] : memref<1x8x256xf32, #tpu.memory_space<vmem>>, vector<1x8x256xf32>
    %5 = vector.shape_cast %4 : vector<1x8x256xf32> to vector<8x256xf32>
    %6 = vector.shape_cast %3 : vector<8x256xf32> to vector<1x8x256xf32>
    tpu.vector_store %arg4[%c0_4, %c0_5, %c0_6], %6 {strides = array<i32>} : memref<1x8x256xf32, #tpu.memory_space<vmem>>, vector<1x8x256xf32>,
    %cst_7 = arith.constant dense<0.000000e+00> : vector<8xf32>
    %7 = vector.multi_reduction <add>, %3, %cst_7 [1] : vector<8x256xf32> to vector<8xf32>
    %8 = vector.shape_cast %7 : vector<8xf32> to vector<8x1xf32>
    %c0_8 = arith.constant 0 : index
    %c0_9 = arith.constant 0 : index
    %c0_10 = arith.constant 0 : index
    %c0_11 = arith.constant 0 : index
    %9 = vector.load %arg5[%c0_8, %c0_9, %c0_10, %c0_11] : memref<1x1x8x2xf32, #tpu.memory_space<vmem>>, vector<1x1x8x1xf32>
    %10 = vector.shape_cast %9 : vector<1x1x8x1xf32> to vector<8x1xf32>
    %11 = vector.shape_cast %8 : vector<8x1xf32> to vector<1x1x8x1xf32>
    tpu.vector_store %arg5[%c0_8, %c0_9, %c0_10, %c0_11], %11 {strides = array<i32>} : memref<1x1x8x2xf32, #tpu.memory_space<vmem>>, vector<1x1x8x1xf32>,
    %12 = arith.mulf %3, %3 : vector<8x256xf32>
    %cst_12 = arith.constant dense<0.000000e+00> : vector<8xf32>
    %13 = vector.multi_reduction <add>, %12, %cst_12 [1] : vector<8x256xf32> to vector<8xf32>
    %14 = vector.shape_cast %13 : vector<8xf32> to vector<8x1xf32>
    %c0_13 = arith.constant 0 : index
    %c0_14 = arith.constant 0 : index
    %c0_15 = arith.constant 0 : index
    %c1 = arith.constant 1 : index
    %15 = vector.load %arg5[%c0_13, %c0_14, %c0_15, %c1] : memref<1x1x8x2xf32, #tpu.memory_space<vmem>>, vector<1x1x8x1xf32>
    %16 = vector.shape_cast %15 : vector<1x1x8x1xf32> to vector<8x1xf32>
    %17 = vector.shape_cast %14 : vector<8x1xf32> to vector<1x1x8x1xf32>
    tpu.vector_store %arg5[%c0_13, %c0_14, %c0_15, %c1], %17 {strides = array<i32>} : memref<1x1x8x2xf32, #tpu.memory_space<vmem>>, vector<1x1x8x1xf32>,
    return
  }
  func.func @transform_0(%arg0: i32, %arg1: i32) -> (i32, i32, i32) {
    %c0_i32 = arith.constant 0 : i32
    %c0_i32_0 = arith.constant 0 : i32
    return %arg0, %c0_i32, %arg1 : i32, i32, i32
  }
  func.func @transform_1(%arg0: i32, %arg1: i32) -> (i32, i32) {
    %c0_i32 = arith.constant 0 : i32
    %c0_i32_0 = arith.constant 0 : i32
    %c0_i32_1 = arith.constant 0 : i32
    return %c0_i32, %c0_i32_0 : i32, i32
  }
  func.func @transform_2(%arg0: i32, %arg1: i32) -> (i32, i32, i32) {
    %c0_i32 = arith.constant 0 : i32
    %c0_i32_0 = arith.constant 0 : i32
    return %arg0, %c0_i32, %arg1 : i32, i32, i32
  }
  func.func @transform_3(%arg0: i32, %arg1: i32) -> (i32, i32, i32, i32) {
    %c0_i32 = arith.constant 0 : i32
    %c0_i32_0 = arith.constant 0 : i32
    %c0_i32_1 = arith.constant 0 : i32
    return %arg0, %arg1, %c0_i32, %c0_i32_0 : i32, i32, i32, i32
  }
}

module attributes {stable_mosaic.version = 11 : i64} {
  func.func @_bn_lrelu_kernel(%arg0: i32, %arg1: i32, %arg2: memref<1x8x256xf32, #tpu.memory_space<vmem>>, %arg3: memref<8x1xf32, #tpu.memory_space<vmem>>, %arg4: memref<8x1xf32, #tpu.memory_space<vmem>>, %arg5: memref<1x8x256xf32, #tpu.memory_space<vmem>>) attributes {dimension_semantics = [#tpu.dimension_semantics<parallel>, #tpu.dimension_semantics<parallel>], iteration_bounds = array<i64: 2, 1>, scalar_prefetch = 0 : i64, scratch_operands = 0 : i64, tpu.core_type = #tpu.core_type<tc>, window_params = [{transform_indices = @transform_0, window_bounds = array<i64: 1, 8, 256>}, {pipeline_mode = #tpu.pipeline_mode<synchronous>, transform_indices = @transform_1, window_bounds = array<i64: 8, 1>}, {pipeline_mode = #tpu.pipeline_mode<synchronous>, transform_indices = @transform_2, window_bounds = array<i64: 8, 1>}, {transform_indices = @transform_3, window_bounds = array<i64: 1, 8, 256>}]} {
    %c0 = arith.constant 0 : index
    %c0_0 = arith.constant 0 : index
    %c0_1 = arith.constant 0 : index
    %0 = vector.load %arg2[%c0, %c0_0, %c0_1] : memref<1x8x256xf32, #tpu.memory_space<vmem>>, vector<1x8x256xf32>
    %1 = vector.shape_cast %0 : vector<1x8x256xf32> to vector<8x256xf32>
    %c0_2 = arith.constant 0 : index
    %c0_3 = arith.constant 0 : index
    %2 = vector.load %arg3[%c0_2, %c0_3] : memref<8x1xf32, #tpu.memory_space<vmem>>, vector<8x1xf32>
    %3 = vector.broadcast %2 : vector<8x1xf32> to vector<8x256xf32>
    %4 = arith.mulf %1, %3 : vector<8x256xf32>
    %c0_4 = arith.constant 0 : index
    %c0_5 = arith.constant 0 : index
    %5 = vector.load %arg4[%c0_4, %c0_5] : memref<8x1xf32, #tpu.memory_space<vmem>>, vector<8x1xf32>
    %6 = vector.broadcast %5 : vector<8x1xf32> to vector<8x256xf32>
    %7 = arith.addf %4, %6 : vector<8x256xf32>
    %cst = arith.constant 0.000000e+00 : f32
    %8 = vector.broadcast %cst : f32 to vector<8x256xf32>
    %9 = arith.cmpf oge, %7, %8 : vector<8x256xf32>
    %cst_6 = arith.constant 2.000000e-01 : f32
    %10 = vector.broadcast %cst_6 : f32 to vector<8x256xf32>
    %11 = arith.mulf %10, %7 : vector<8x256xf32>
    %12 = arith.select %9, %7, %11 : vector<8x256xi1>, vector<8x256xf32>
    %c0_7 = arith.constant 0 : index
    %c0_8 = arith.constant 0 : index
    %c0_9 = arith.constant 0 : index
    %13 = vector.load %arg5[%c0_7, %c0_8, %c0_9] : memref<1x8x256xf32, #tpu.memory_space<vmem>>, vector<1x8x256xf32>
    %14 = vector.shape_cast %13 : vector<1x8x256xf32> to vector<8x256xf32>
    %15 = vector.shape_cast %12 : vector<8x256xf32> to vector<1x8x256xf32>
    tpu.vector_store %arg5[%c0_7, %c0_8, %c0_9], %15 {strides = array<i32>} : memref<1x8x256xf32, #tpu.memory_space<vmem>>, vector<1x8x256xf32>,
    return
  }
  func.func @transform_0(%arg0: i32, %arg1: i32) -> (i32, i32, i32) {
    %c0_i32 = arith.constant 0 : i32
    %c0_i32_0 = arith.constant 0 : i32
    return %arg0, %c0_i32, %arg1 : i32, i32, i32
  }
  func.func @transform_1(%arg0: i32, %arg1: i32) -> (i32, i32) {
    %c0_i32 = arith.constant 0 : i32
    %c0_i32_0 = arith.constant 0 : i32
    %c0_i32_1 = arith.constant 0 : i32
    return %c0_i32, %c0_i32_0 : i32, i32
  }
  func.func @transform_2(%arg0: i32, %arg1: i32) -> (i32, i32) {
    %c0_i32 = arith.constant 0 : i32
    %c0_i32_0 = arith.constant 0 : i32
    %c0_i32_1 = arith.constant 0 : i32
    return %c0_i32, %c0_i32_0 : i32, i32
  }
  func.func @transform_3(%arg0: i32, %arg1: i32) -> (i32, i32, i32) {
    %c0_i32 = arith.constant 0 : i32
    %c0_i32_0 = arith.constant 0 : i32
    return %arg0, %c0_i32, %arg1 : i32, i32, i32
  }
}

</mosaic_0001>

<bundles_post_ra>
// kernel: conv2d_1x1_bn_lrelu.2
= control target key start
LH: loop header
LB: loop body
LE: loop exit
PB: predicated region body
PF: predicated region fallthrough
CT: control target
= control target key end

     0   :  { %s522_s12 = smov 0   ;;  %s524_s13 = smov 0   ;;  %s561_s0 = inlined_call_operand.vmem [shape: bf16[2,4,256], index: 0, kind: input, shape index: {}]   ;;  %s562_s1 = inlined_call_operand.vmem [shape: bf16[8,4], index: 1, kind: input, shape index: {}]   ;;  %s563_s2 = inlined_call_operand.vmem [shape: f32[2,8,256], index: 2, kind: output, shape index: {0}]   ;;  %s564_s3 = inlined_call_operand.vmem [shape: f32[2,1,8,2], index: 3, kind: output, shape index: {1}]  }
   0x1   :  { %s526_s14 = smov 0  }
   0x2 LB: > { %s26_s15 = sadd.s32 1, %s495_s13  ;;  %p439_p0 = scmp.ge.s32.totalorder %s499_s14, 1  ;;  %s499_s14 = sphi %s526_s14, %s14_s14   ;;  %s495_s13 = sphi %s524_s13, %s566_s13   ;;  %s491_s12 = sphi %s522_s12, %s565_s12  }
   0x3   : > { %p28_p1 = scmp.ge.s32.totalorder %s26_s15, 2  ;;  %p163_p2 = scmp.lt.s32.totalorder %s499_s14, 3 }
   0x5   : > { %s568_s15 = smov (%p28_p1, %s26_s15), 0  ;;  %p164_p3 = pnand %p439_p0, %p163_p2 }
   0x6   : > { %p203_p4 = scmp.lt.s32.totalorder (!%p164_p3), %s491_s12, 1  ;;  %v501_v0 = vmov (!%p164_p3), 0   ;;  %vm245_vm0 = vcmask (!%p164_p3), 1041408   ;;  %v230_v4 = vld [vmem:[%s562_s1] sm:$0xf] (!%p164_p3)  ;;  %vm241_vm1 = vcmask (!%p164_p3), 31744  }
   0x7   : > { %167 = sbr.rel (%p164_p3) target bundleno = 386 (0x182), region = 28  ;;  %284 = vmatprep.mubr.bf16.mxu0 (!%p164_p3), %v501_v0  ;;  %vm298_vm2 = vcmask (!%p164_p3), 7168   ;;  %vm305_vm3 = vcmask (!%p164_p3), 15368  }
   0xe   : > { %s570_s12 = smov (!%p203_p4, %s491_s12), 1 }
   0xf   : > { %s450_s16 = sshll.u32 %s570_s12, 2  ;;  %s451_s22 = sshll.u32 %s570_s12, 4 }
  0x10   : > { %s210_s19 = scalar_lea.vmem %s561_s0, %s450_s16  ;;  %s220_s25 = scalar_lea.vmem %s563_s2, %s451_s22 }
  0x11   : > { %v445_v1 = vld.sshfl [vmem:[%s210_s19] sm:$0x33 pattern:$0x76325410]  ;;  %s444_s26 = sshll.u32 %s570_s12, 3 }
  0x12   : > { %v240_v2 = vcombine.high %v445_v1, %v445_v1  ;;  %v247_v3 = vsel %vm245_vm0, %v445_v1, 0  ;;  %s228_s29 = scalar_lea.vmem %s564_s3, %s444_s26 }
  0x14   : > { %446 = vmatprep.subr.msk.bf16.mxu0 %vm245_vm0, %v240_v2 }
  0x15   : > { %253 = vmatpush1.bf16.msra.mxu0 %v247_v3 }
  0x18   : > { %447 = vmatmul.mubr.msk.bf16.vlgmr.msra.gmra.mrb[0].mxu0 %vm241_vm1, %v230_v4 }
  0xeb   : > { %v286_v5 = vpop.f32.mrb[0].mxu0 }
  0xec   : > { %293 = vst [vmem:[%s220_s25] sm:$0xff] %v286_v5  ;;  %v288_v6 = vpop.f32.mrb[1].mxu0  ;;  %v300_v7 = vmul.f32 %v286_v5, %v286_v5 }
  0xed   : > { %294 = vst [vmem:[%s220_s25 + $0x8] sm:$0xff] %v288_v6  ;;  %v290_v8 = vpop.f32.mrb[2].mxu0  ;;  %v295_v9 = vadd.f32 %v288_v6, %v286_v5  ;;  %v301_v10 = vmul.f32 %v288_v6, %v288_v6 }
  0xee   : > { %v291_v11 = vpop.f32.mrb[3].mxu0 }
  0xef   : > { %296 = vadd.xlane.f32.xlu0 %v295_v9  ;;  %v302_v12 = vadd.f32 %v301_v10, %v300_v7 }
  0xf3   : > { %303 = vadd.xlane.f32.xlu0 %v302_v12 }
 0x17c   : > { %v297_v13 = vpop.xlane.xlu0 %296 }
 0x17d   : > { %299 = vst.msk [vmem:[%s228_s29] sm:$0xff] %vm298_vm2, %v297_v13 }
 0x180   : > { %v304_v14 = vpop.xlane.xlu0 %303 }
 0x181   : > { %306 = vst.msk [vmem:[%s228_s29] sm:$0xff] %vm305_vm3, %v304_v14 }
 0x182 PF: > { %s14_s14 = sadd.s32 1, %s499_s14   ;;  %s565_s12 = smov %s495_s13 }
 0x183   : > { %p11_p5 = scmp.ge.s32.totalorder %s14_s14, 4   ;;  %s566_s13 = smov %s568_s15 }
 0x185   :  { %13 = sbr.rel (!%p11_p5) target bundleno = 2 (0x2), region = 70 }

// kernel: conv2d_1x1_bn_lrelu.3
= control target key start
LH: loop header
LB: loop body
LE: loop exit
PB: predicated region body
PF: predicated region fallthrough
CT: control target
= control target key end

     0   :  { %s407_s12 = smov 0   ;;  %s409_s13 = smov 0   ;;  %s446_s0 = inlined_call_operand.vmem [shape: f32[2,8,256], index: 0, kind: input, shape index: {}]   ;;  %s447_s1 = inlined_call_operand.vmem [shape: f32[8,1], index: 1, kind: input, shape index: {}]   ;;  %s448_s2 = inlined_call_operand.vmem [shape: f32[8,1], index: 2, kind: input, shape index: {}]   ;;  %s449_s3 = inlined_call_operand.vmem [shape: f32[2,8,256], index: 3, kind: output, shape index: {}]  }
   0x1   :  { %s411_s14 = smov 0  }
   0x2 LB: > { %s25_s15 = sadd.s32 1, %s380_s13  ;;  %p327_p0 = scmp.ge.s32.totalorder %s384_s14, 1  ;;  %s384_s14 = sphi %s411_s14, %s13_s14   ;;  %s380_s13 = sphi %s409_s13, %s451_s13   ;;  %s376_s12 = sphi %s407_s12, %s450_s12  }
   0x3   : > { %p27_p1 = scmp.ge.s32.totalorder %s25_s15, 2  ;;  %p158_p2 = scmp.lt.s32.totalorder %s384_s14, 3 }
   0x5   : > { %s453_s15 = smov (%p27_p1, %s25_s15), 0  ;;  %p159_p3 = pnand %p327_p0, %p158_p2 }
   0x6   : > { %v212_v0 = vld [vmem:[%s447_s1] sm:$0xff] (!%p159_p3)  ;;  %v386_v1 = vmov (!%p159_p3), 0   ;;  %p191_p4 = scmp.lt.s32.totalorder (!%p159_p3), %s376_s12, 1 }
   0x7   : > { %162 = sbr.rel (%p159_p3) target bundleno = 146 (0x92), region = 32  ;;  %361 = vset.pattern.permute.xlu0 (!%p159_p3), %v386_v1  ;;  %v220_v2 = vld [vmem:[%s448_s2] sm:$0xff] (!%p159_p3) }
   0x8   : > { %215 = vperm.xlu0 (!%p159_p3), %361, %v212_v0  }
   0xc   : > { %223 = vperm.xlu0 (!%p159_p3), %361, %v220_v2  }
   0xe   : > { %s455_s12 = smov (!%p191_p4, %s376_s12), 1 }
   0xf   : > { %s334_s20 = sshll.u32 %s455_s12, 4 }
  0x10   : > { %s198_s23 = scalar_lea.vmem %s446_s0, %s334_s20  ;;  %s208_s26 = scalar_lea.vmem %s449_s3, %s334_s20 }
  0x11   : > { %v210_v4 = vld [vmem:[%s198_s23] sm:$0xff]  ;;  %v211_v5 = vld [vmem:[%s198_s23 + $0x8] sm:$0xff] }
  0x87   : > { %v216_v3 = vpop.permute.xlu0 %215 }
  0x88   : > { %v218_v6 = vmul.f32 %v216_v3, %v210_v4  ;;  %v219_v7 = vmul.f32 %v216_v3, %v211_v5 }
  0x8b   : > { %v224_v8 = vpop.permute.xlu0 %223 }
  0x8c   : > { %v226_v9 = vadd.f32 %v224_v8, %v218_v6  ;;  %v227_v10 = vadd.f32 %v224_v8, %v219_v7 }
  0x8e   : > { %vm228_vm0 = vcmp.ge.f32.partialorder %v226_v9, 0.0  ;;  %vm229_vm1 = vcmp.ge.f32.partialorder %v227_v10, 0.0  ;;  %v230_v11 = vmul.f32 0.2, %v226_v9  ;;  %v231_v12 = vmul.f32 0.2, %v227_v10 }
  0x90   : > { %v232_v13 = vsel %vm228_vm0, %v226_v9, %v230_v11  ;;  %v233_v14 = vsel %vm229_vm1, %v227_v10, %v231_v12 }
  0x91   : > { %234 = vst [vmem:[%s208_s26] sm:$0xff] %v232_v13  ;;  %235 = vst [vmem:[%s208_s26 + $0x8] sm:$0xff] %v233_v14 }
  0x92 PF: > { %s13_s14 = sadd.s32 1, %s384_s14   ;;  %s450_s12 = smov %s380_s13 }
  0x93   : > { %p10_p5 = scmp.ge.s32.totalorder %s13_s14, 4   ;;  %s451_s13 = smov %s453_s15 }
  0x95   :  { %12 = sbr.rel (!%p10_p5) target bundleno = 2 (0x2), region = 62 }

</bundles_post_ra>
